<compile_context>
chip_gen: v5e
topology: v5e:2x2
jax: 0.10.0
libtpu: 0.0.40
codegen_flags: <defaults>
</compile_context>

<pallas_src>
import jax
import jax.numpy as jnp
import numpy as np
from jax.experimental import pallas as pl
from jax.experimental.pallas import tpu as pltpu

# ----- static model config (mirrors the PyTorch CNN.__init__) -----
MAX_LEN_FEATURES = 40            # the script's `max_len_features` (chosen small)
IN_W = 23
KH, KW = 10, 23
STRIDE = 3
C_OUT = 128                      # conv1 output channels
POOL = 5                         # max_pool1d kernel (= stride)
H_OUT = (MAX_LEN_FEATURES - KH) // STRIDE + 1      # 11 conv rows (width -> 1)
L_POOL = (H_OUT - POOL) // POOL + 1                # 2 pooled positions
ROWS_USED = L_POOL * POOL                          # 10 conv rows survive pooling
TO_LINEAR = C_OUT * L_POOL                         # self._to_linear
FC1 = 128
NUM_CLASSES = 4

K_RAW = KH * KW                  # 230 = im2col patch size (Mosaic lane-pads in VMEM)
OUT_PAD = 128                    # fc2 output lanes padded (sliced to 4 in glue)
TB_MAX = 512                     # max batch tile (bf16 patch tile ~ 2.4 MiB)


def cnn_kernel(patch_ref, wc_ref, bc_ref, w1_ref, b1_ref, w2_ref, b2_ref, out_ref):
    pool, l_pool, tb, k_raw = patch_ref.shape
    c_out = wc_ref.shape[1]

    # conv1: one MXU matmul over every (pool offset, pooled position, sample) row.
    pm = patch_ref[...].reshape(pool * l_pool * tb, k_raw)             # bf16
    h = jnp.dot(pm, wc_ref[...], preferred_element_type=jnp.float32)   # f32 acc
    h = jnp.maximum(h + bc_ref[...], 0.0)                              # (10*TB, C_OUT)

    # max_pool1d(kernel=5, stride=5): element-wise max tree over the pool axis (VPU).
    h3 = h.reshape(pool, l_pool * tb, c_out)
    pooled = h3[0]
    for p in range(1, pool):
        pooled = jnp.maximum(pooled, h3[p])                            # (L_POOL*TB, C_OUT)

    # TODO(synk): Dropout(p=0.7) layers are identity in eval/inference; not implemented.

    # fc1: single K = L_POOL*C_OUT = 256 matmul.  PyTorch's channel-major flatten
    # (in_index = c*L_POOL + l) is reproduced by the (l, c)-ordered w1 rows built
    # in the glue; the lane-concat of the two 128-wide pooled slabs is free.
    flat = jnp.concatenate([pooled[l * tb:(l + 1) * tb] for l in range(l_pool)],
                           axis=1)                                     # (TB, 2*C_OUT) f32
    h1 = jnp.dot(flat.astype(w1_ref.dtype), w1_ref[...],
                 preferred_element_type=jnp.float32)
    h1 = jnp.maximum(h1 + b1_ref[...], 0.0)                            # (TB, FC1)

    # fc2 (+ bias): one lane-dense full-tile bf16 store.
    out = jnp.dot(h1.astype(w2_ref.dtype), w2_ref[...],
                  preferred_element_type=jnp.float32) + b2_ref[...]
    out_ref[...] = out.astype(out_ref.dtype)


@jax.jit
def cnn_forward(x_nchw, conv_w, conv_b, fc1_w, fc1_b, fc2_w, fc2_b):
    n = x_nchw.shape[0]
    # Batch tile: multiple of 16 (bf16 sublane tile).  Cap at ceil(n/2) so large
    # batches always produce >= 2 "parallel" grid steps (v7x megacore split);
    # tiny batches collapse to a single minimal tile.
    half = max(16, -(-n // 2))
    tb = min(TB_MAX, ((half + 15) // 16) * 16)
    n_pad = ((n + tb - 1) // tb) * tb
    grid = (n_pad // tb,)

    # ---- glue (plain JAX): early bf16 cast + single-gather im2col, no K pad ----
    # Only the ROWS_USED=10 conv rows that survive pooling are materialized; the
    # dead 11th conv row is intentionally dropped (max_pool1d floor behavior).
    x_bf = x_nchw[:, 0, :, :].astype(jnp.bfloat16)                     # (N, H, W) bf16
    row_idx = (jnp.arange(ROWS_USED) * STRIDE)[:, None] + jnp.arange(KH)[None, :]
    pat = x_bf[:, row_idx, :]                                          # (N, 10, KH, W)
    pat = pat.reshape(n, L_POOL, POOL, K_RAW)                          # conv row h = l*POOL + p
    pat = jnp.transpose(pat, (2, 1, 0, 3))                             # (POOL, L_POOL, N, K_RAW)
    pat = jnp.pad(pat, ((0, 0), (0, 0), (0, n_pad - n), (0, 0)))       # batch pad only

    wc = conv_w.reshape(C_OUT, K_RAW).T.astype(jnp.bfloat16)           # (230, 128)
    bc = conv_b.reshape(1, C_OUT).astype(jnp.float32)
    # fc1_w is (FC1, C_OUT*L_POOL) with PyTorch channel-major flatten order
    # (in_index = c*L_POOL + l); re-order rows to l*C_OUT + c for the fused matmul.
    w1 = jnp.transpose(fc1_w.reshape(FC1, C_OUT, L_POOL), (2, 1, 0)).reshape(
        L_POOL * C_OUT, FC1).astype(jnp.bfloat16)                      # (256, 128)
    b1 = fc1_b.reshape(1, FC1).astype(jnp.float32)
    w2 = jnp.pad(fc2_w.T, ((0, 0), (0, OUT_PAD - NUM_CLASSES))).astype(jnp.bfloat16)
    b2 = jnp.pad(fc2_b.reshape(1, NUM_CLASSES),
                 ((0, 0), (0, OUT_PAD - NUM_CLASSES))).astype(jnp.float32)

    # Advisory cost estimate so XLA can overlap this (tiny) kernel with the glue.
    flops = (2 * POOL * L_POOL * K_RAW * C_OUT
             + 2 * (L_POOL * C_OUT) * FC1
             + 2 * FC1 * OUT_PAD) * n_pad
    bytes_accessed = (pat.size * 2 + wc.size * 2 + w1.size * 2 + w2.size * 2
                      + (bc.size + b1.size + b2.size) * 4
                      + n_pad * OUT_PAD * 2)

    out_pad = pl.pallas_call(
        cnn_kernel,
        out_shape=jax.ShapeDtypeStruct((n_pad, OUT_PAD), jnp.bfloat16),
        grid_spec=pltpu.PrefetchScalarGridSpec(
            num_scalar_prefetch=0,
            grid=grid,
            in_specs=[
                pl.BlockSpec((POOL, L_POOL, tb, K_RAW), lambda i: (0, 0, i, 0)),
                pl.BlockSpec((K_RAW, C_OUT), lambda i: (0, 0)),
                pl.BlockSpec((1, C_OUT), lambda i: (0, 0)),
                pl.BlockSpec((L_POOL * C_OUT, FC1), lambda i: (0, 0)),
                pl.BlockSpec((1, FC1), lambda i: (0, 0)),
                pl.BlockSpec((FC1, OUT_PAD), lambda i: (0, 0)),
                pl.BlockSpec((1, OUT_PAD), lambda i: (0, 0)),
            ],
            out_specs=pl.BlockSpec((tb, OUT_PAD), lambda i: (i, 0)),
        ),
        compiler_params=pltpu.CompilerParams(
            dimension_semantics=("parallel",),
            # Let XLA fuse the im2col transpose/pad producer into the patch
            # operand instead of materializing it in HBM.
            allow_input_fusion=[True, False, False, False, False, False, False],
        ),
        cost_estimate=pl.CostEstimate(flops=flops, transcendentals=0,
                                      bytes_accessed=bytes_accessed),
    )(pat, wc, bc, w1, b1, w2, b2)

    # Padded batch rows produce garbage logits (bias->relu->fc); slice them off.
    return out_pad[:n, :NUM_CLASSES].astype(jnp.float32)


def reference_forward(x_nchw, conv_w, conv_b, fc1_w, fc1_b, fc2_w, fc2_b):
    """Pure-JAX reference matching the PyTorch forward (eval mode)."""
    hp = jax.lax.Precision.HIGHEST
    y = jax.lax.conv_general_dilated(
        x_nchw, conv_w, (STRIDE, STRIDE), "VALID",
        dimension_numbers=("NCHW", "OIHW", "NCHW"), precision=hp)
    y = jnp.maximum(y + conv_b[None, :, None, None], 0.0)      # (N, C, H_OUT, 1)
    y = jnp.squeeze(y, axis=3)                                  # (N, C, H_OUT)
    y = y[:, :, :L_POOL * POOL].reshape(y.shape[0], C_OUT, L_POOL, POOL).max(axis=3)
    flat = y.reshape(y.shape[0], TO_LINEAR)                     # channel-major flatten
    h1 = jnp.maximum(jnp.dot(flat, fc1_w.T, precision=hp) + fc1_b, 0.0)
    return jnp.dot(h1, fc2_w.T, precision=hp) + fc2_b


if __name__ == "__main__":
    key = jax.random.PRNGKey(0)
    ks = jax.random.split(key, 7)
    N = 2
    x = jax.random.normal(ks[0], (N, 1, MAX_LEN_FEATURES, IN_W), jnp.float32)
    conv_w = jax.random.normal(ks[1], (C_OUT, 1, KH, KW), jnp.float32) / np.sqrt(K_RAW)
    conv_b = jax.random.normal(ks[2], (C_OUT,), jnp.float32) * 0.1
    fc1_w = jax.random.normal(ks[3], (FC1, TO_LINEAR), jnp.float32) / np.sqrt(TO_LINEAR)
    fc1_b = jax.random.normal(ks[4], (FC1,), jnp.float32) * 0.1
    fc2_w = jax.random.normal(ks[5], (NUM_CLASSES, FC1), jnp.float32) / np.sqrt(FC1)
    fc2_b = jax.random.normal(ks[6], (NUM_CLASSES,), jnp.float32) * 0.1

    out = cnn_forward(x, conv_w, conv_b, fc1_w, fc1_b, fc2_w, fc2_b)
    out = jax.block_until_ready(out)

    ref = reference_forward(x, conv_w, conv_b, fc1_w, fc1_b, fc2_w, fc2_b)
    np.testing.assert_allclose(np.asarray(out), np.asarray(ref), rtol=5e-2, atol=5e-2)
    print("KERNEL_OK")
</pallas_src>

<mosaic_0001>
module attributes {stable_mosaic.version = 11 : i64} {
  func.func @cnn_kernel(%arg0: i32, %arg1: memref<5x2x16x230xbf16, #tpu.memory_space<vmem>>, %arg2: memref<230x128xbf16, #tpu.memory_space<vmem>>, %arg3: memref<1x128xf32, #tpu.memory_space<vmem>>, %arg4: memref<256x128xbf16, #tpu.memory_space<vmem>>, %arg5: memref<1x128xf32, #tpu.memory_space<vmem>>, %arg6: memref<128x128xbf16, #tpu.memory_space<vmem>>, %arg7: memref<1x128xf32, #tpu.memory_space<vmem>>, %arg8: memref<16x128xbf16, #tpu.memory_space<vmem>>) attributes {dimension_semantics = [#tpu.dimension_semantics<parallel>], iteration_bounds = array<i64: 1>, scalar_prefetch = 0 : i64, scratch_operands = 0 : i64, tpu.core_type = #tpu.core_type<tc>, window_params = [{transform_indices = @transform_0, window_bounds = array<i64: 5, 2, 16, 230>}, {pipeline_mode = #tpu.pipeline_mode<synchronous>, transform_indices = @transform_1, window_bounds = array<i64: 230, 128>}, {pipeline_mode = #tpu.pipeline_mode<synchronous>, transform_indices = @transform_2, window_bounds = array<i64: 1, 128>}, {pipeline_mode = #tpu.pipeline_mode<synchronous>, transform_indices = @transform_3, window_bounds = array<i64: 256, 128>}, {pipeline_mode = #tpu.pipeline_mode<synchronous>, transform_indices = @transform_4, window_bounds = array<i64: 1, 128>}, {pipeline_mode = #tpu.pipeline_mode<synchronous>, transform_indices = @transform_5, window_bounds = array<i64: 128, 128>}, {pipeline_mode = #tpu.pipeline_mode<synchronous>, transform_indices = @transform_6, window_bounds = array<i64: 1, 128>}, {transform_indices = @transform_7, window_bounds = array<i64: 16, 128>}]} {
    %c0 = arith.constant 0 : index
    %c0_0 = arith.constant 0 : index
    %c0_1 = arith.constant 0 : index
    %c0_2 = arith.constant 0 : index
    %0 = vector.load %arg1[%c0, %c0_0, %c0_1, %c0_2] : memref<5x2x16x230xbf16, #tpu.memory_space<vmem>>, vector<5x2x16x230xbf16>
    %1 = vector.shape_cast %0 : vector<5x2x16x230xbf16> to vector<160x230xbf16>
    %c0_3 = arith.constant 0 : index
    %c0_4 = arith.constant 0 : index
    %2 = vector.load %arg2[%c0_3, %c0_4] : memref<230x128xbf16, #tpu.memory_space<vmem>>, vector<230x128xbf16>
    %cst = arith.constant dense<0.000000e+00> : vector<160x128xf32>
    %3 = tpu.matmul %1, %2, %cst {dimension_numbers = #tpu.dot_dimension_numbers<[1], [0], [0], [1], [0, 0, 1, 1], [], []>} : vector<160x230xbf16>, vector<230x128xbf16>, vector<160x128xf32> -> vector<160x128xf32>
    %c0_5 = arith.constant 0 : index
    %c0_6 = arith.constant 0 : index
    %4 = vector.load %arg3[%c0_5, %c0_6] : memref<1x128xf32, #tpu.memory_space<vmem>>, vector<1x128xf32>
    %5 = vector.broadcast %4 : vector<1x128xf32> to vector<160x128xf32>
    %6 = arith.addf %3, %5 : vector<160x128xf32>
    %cst_7 = arith.constant 0.000000e+00 : f32
    %7 = vector.broadcast %cst_7 : f32 to vector<160x128xf32>
    %8 = arith.maximumf %6, %7 : vector<160x128xf32>
    %9 = vector.shape_cast %8 : vector<160x128xf32> to vector<5x32x128xf32>
    %10 = vector.extract_strided_slice %9 {offsets = [0, 0, 0], sizes = [1, 32, 128], strides = [1, 1, 1]} : vector<5x32x128xf32> to vector<1x32x128xf32>
    %11 = vector.shape_cast %10 : vector<1x32x128xf32> to vector<32x128xf32>
    %12 = vector.extract_strided_slice %9 {offsets = [1, 0, 0], sizes = [1, 32, 128], strides = [1, 1, 1]} : vector<5x32x128xf32> to vector<1x32x128xf32>
    %13 = vector.shape_cast %12 : vector<1x32x128xf32> to vector<32x128xf32>
    %14 = arith.maximumf %11, %13 : vector<32x128xf32>
    %15 = vector.extract_strided_slice %9 {offsets = [2, 0, 0], sizes = [1, 32, 128], strides = [1, 1, 1]} : vector<5x32x128xf32> to vector<1x32x128xf32>
    %16 = vector.shape_cast %15 : vector<1x32x128xf32> to vector<32x128xf32>
    %17 = arith.maximumf %14, %16 : vector<32x128xf32>
    %18 = vector.extract_strided_slice %9 {offsets = [3, 0, 0], sizes = [1, 32, 128], strides = [1, 1, 1]} : vector<5x32x128xf32> to vector<1x32x128xf32>
    %19 = vector.shape_cast %18 : vector<1x32x128xf32> to vector<32x128xf32>
    %20 = arith.maximumf %17, %19 : vector<32x128xf32>
    %21 = vector.extract_strided_slice %9 {offsets = [4, 0, 0], sizes = [1, 32, 128], strides = [1, 1, 1]} : vector<5x32x128xf32> to vector<1x32x128xf32>
    %22 = vector.shape_cast %21 : vector<1x32x128xf32> to vector<32x128xf32>
    %23 = arith.maximumf %20, %22 : vector<32x128xf32>
    %24 = vector.extract_strided_slice %23 {offsets = [0, 0], sizes = [16, 128], strides = [1, 1]} : vector<32x128xf32> to vector<16x128xf32>
    %25 = vector.extract_strided_slice %23 {offsets = [16, 0], sizes = [16, 128], strides = [1, 1]} : vector<32x128xf32> to vector<16x128xf32>
    %26 = tpu.concatenate %24, %25 in 1 : vector<16x128xf32>, vector<16x128xf32> -> vector<16x256xf32>
    %27 = arith.truncf %26 : vector<16x256xf32> to vector<16x256xbf16>
    %c0_8 = arith.constant 0 : index
    %c0_9 = arith.constant 0 : index
    %28 = vector.load %arg4[%c0_8, %c0_9] : memref<256x128xbf16, #tpu.memory_space<vmem>>, vector<256x128xbf16>
    %cst_10 = arith.constant dense<0.000000e+00> : vector<16x128xf32>
    %29 = tpu.matmul %27, %28, %cst_10 {dimension_numbers = #tpu.dot_dimension_numbers<[1], [0], [0], [1], [0, 0, 1, 1], [], []>} : vector<16x256xbf16>, vector<256x128xbf16>, vector<16x128xf32> -> vector<16x128xf32>
    %c0_11 = arith.constant 0 : index
    %c0_12 = arith.constant 0 : index
    %30 = vector.load %arg5[%c0_11, %c0_12] : memref<1x128xf32, #tpu.memory_space<vmem>>, vector<1x128xf32>
    %31 = vector.broadcast %30 : vector<1x128xf32> to vector<16x128xf32>
    %32 = arith.addf %29, %31 : vector<16x128xf32>
    %cst_13 = arith.constant 0.000000e+00 : f32
    %33 = vector.broadcast %cst_13 : f32 to vector<16x128xf32>
    %34 = arith.maximumf %32, %33 : vector<16x128xf32>
    %35 = arith.truncf %34 : vector<16x128xf32> to vector<16x128xbf16>
    %c0_14 = arith.constant 0 : index
    %c0_15 = arith.constant 0 : index
    %36 = vector.load %arg6[%c0_14, %c0_15] : memref<128x128xbf16, #tpu.memory_space<vmem>>, vector<128x128xbf16>
    %cst_16 = arith.constant dense<0.000000e+00> : vector<16x128xf32>
    %37 = tpu.matmul %35, %36, %cst_16 {dimension_numbers = #tpu.dot_dimension_numbers<[1], [0], [0], [1], [0, 0, 1, 1], [], []>} : vector<16x128xbf16>, vector<128x128xbf16>, vector<16x128xf32> -> vector<16x128xf32>
    %c0_17 = arith.constant 0 : index
    %c0_18 = arith.constant 0 : index
    %38 = vector.load %arg7[%c0_17, %c0_18] : memref<1x128xf32, #tpu.memory_space<vmem>>, vector<1x128xf32>
    %39 = vector.broadcast %38 : vector<1x128xf32> to vector<16x128xf32>
    %40 = arith.addf %37, %39 : vector<16x128xf32>
    %41 = arith.truncf %40 : vector<16x128xf32> to vector<16x128xbf16>
    %c0_19 = arith.constant 0 : index
    %c0_20 = arith.constant 0 : index
    %42 = vector.load %arg8[%c0_19, %c0_20] : memref<16x128xbf16, #tpu.memory_space<vmem>>, vector<16x128xbf16>
    tpu.vector_store %arg8[%c0_19, %c0_20], %41 {strides = array<i32>} : memref<16x128xbf16, #tpu.memory_space<vmem>>, vector<16x128xbf16>,
    return
  }
  func.func @transform_0(%arg0: i32) -> (i32, i32, i32, i32) {
    %c0_i32 = arith.constant 0 : i32
    %c0_i32_0 = arith.constant 0 : i32
    %c0_i32_1 = arith.constant 0 : i32
    %c0_i32_2 = arith.constant 0 : i32
    return %c0_i32, %c0_i32_0, %arg0, %c0_i32_1 : i32, i32, i32, i32
  }
  func.func @transform_1(%arg0: i32) -> (i32, i32) {
    %c0_i32 = arith.constant 0 : i32
    %c0_i32_0 = arith.constant 0 : i32
    %c0_i32_1 = arith.constant 0 : i32
    return %c0_i32, %c0_i32_0 : i32, i32
  }
  func.func @transform_2(%arg0: i32) -> (i32, i32) {
    %c0_i32 = arith.constant 0 : i32
    %c0_i32_0 = arith.constant 0 : i32
    %c0_i32_1 = arith.constant 0 : i32
    return %c0_i32, %c0_i32_0 : i32, i32
  }
  func.func @transform_3(%arg0: i32) -> (i32, i32) {
    %c0_i32 = arith.constant 0 : i32
    %c0_i32_0 = arith.constant 0 : i32
    %c0_i32_1 = arith.constant 0 : i32
    return %c0_i32, %c0_i32_0 : i32, i32
  }
  func.func @transform_4(%arg0: i32) -> (i32, i32) {
    %c0_i32 = arith.constant 0 : i32
    %c0_i32_0 = arith.constant 0 : i32
    %c0_i32_1 = arith.constant 0 : i32
    return %c0_i32, %c0_i32_0 : i32, i32
  }
  func.func @transform_5(%arg0: i32) -> (i32, i32) {
    %c0_i32 = arith.constant 0 : i32
    %c0_i32_0 = arith.constant 0 : i32
    %c0_i32_1 = arith.constant 0 : i32
    return %c0_i32, %c0_i32_0 : i32, i32
  }
  func.func @transform_6(%arg0: i32) -> (i32, i32) {
    %c0_i32 = arith.constant 0 : i32
    %c0_i32_0 = arith.constant 0 : i32
    %c0_i32_1 = arith.constant 0 : i32
    return %c0_i32, %c0_i32_0 : i32, i32
  }
  func.func @transform_7(%arg0: i32) -> (i32, i32) {
    %c0_i32 = arith.constant 0 : i32
    %c0_i32_0 = arith.constant 0 : i32
    return %arg0, %c0_i32 : i32, i32
  }
}

</mosaic_0001>

<bundles_post_ra>
// kernel: cnn_forward.2
= control target key start
LH: loop header
LB: loop body
LE: loop exit
PB: predicated region body
PF: predicated region fallthrough
CT: control target
= control target key end

     0   :  { %s2054_s0 = inlined_call_operand.vmem [shape: bf16[230,128], index: 0, kind: input, shape index: {}]   ;;  %s2055_s1 = inlined_call_operand.vmem [shape: f32[1,128], index: 1, kind: input, shape index: {}]   ;;  %s2056_s2 = inlined_call_operand.vmem [shape: bf16[256,128], index: 2, kind: input, shape index: {}]   ;;  %s2057_s3 = inlined_call_operand.vmem [shape: f32[1,128], index: 3, kind: input, shape index: {}]   ;;  %s2058_s4 = inlined_call_operand.vmem [shape: bf16[128,128], index: 4, kind: input, shape index: {}]   ;;  %s2059_s5 = inlined_call_operand.vmem [shape: f32[1,128], index: 5, kind: input, shape index: {}]   ;;  %s2060_s6 = inlined_call_operand.vmem [shape: bf16[5,2,2,230], index: 6, kind: input, shape index: {}]   ;;  %s2061_s7 = inlined_call_operand.<no memory space> [shape: bf16[], index: 7, kind: input, shape index: {}]   ;;  %s2062_s8 = inlined_call_operand.vmem [shape: bf16[16,128], index: 8, kind: output, shape index: {}]  }
   0x1   :  { %v13_v0 = vstv %s2061_s7 }
   0x2   :  { %v1685_v1 = vunpack.i.l.bf16 %v13_v0 }
   0x3   :  { %v1533_v2 = vld [vmem:[%s2054_s0 + $0x38] sm:$0xff]  ;;  %v619_v3 = vld [vmem:[%s2054_s0 + $0x70] sm:$0x7]  ;;  %v38_v4 = vlaneseq  ;;  %vm832_vm0 = vcmask 1042432   ;;  %v1539_v11 = vld [vmem:[%s2054_s0 + $0x68] sm:$0xff]  ;;  %vm801_vm3 = vcmask 834560  }
   0x4   :  { %v1567_v5 = vpack.c.bf16 %v1685_v1, %v1685_v1  ;;  %v771_v6 = vunpack.c.l.b16 %v619_v3  ;;  %836 = vmatpush.bf16.msra.mxu0 %v1533_v2  ;;  %v1532_v7 = vld [vmem:[%s2054_s0 + $0x30] sm:$0xff]  ;;  %1619 = vmatpush.bf16.msra.mxu3 %v1533_v2  ;;  %v1531_v12 = vld [vmem:[%s2054_s0 + $0x28] sm:$0xff]  ;;  %v1245_v15 = vld [vmem:[%s2060_s6 + $0x1] sm:$0x1] }
   0x5   :  { %v1698_v8 = vshrl.u32 %v38_v4, 7  ;;  %v65_v9 = vand.u32 127, %v38_v4  ;;  %v35_v16 = vld [vmem:[%s2060_s6] sm:$0x1]  ;;  %v57_v17 = vunpack.c.l.bf16 %v1245_v15  ;;  %v1247_v19 = vld [vmem:[%s2060_s6 + $0x3] sm:$0x1] }
   0x6   :  { %1568 = vst [vmem:[#allocation7 + $0x8] sm:$0xff] %v1567_v5   ;;  %v786_v10 = vpack.c.b16 %v771_v6, %v771_v6  ;;  %v36_v18 = vunpack.c.l.bf16 %v35_v16  ;;  %v1246_v20 = vld [vmem:[%s2060_s6 + $0x2] sm:$0x1]  ;;  %v111_v21 = vunpack.c.l.bf16 %v1247_v19  ;;  %v1537_v35 = vld [vmem:[%s2054_s0 + $0x58] sm:$0xff]  ;;  %v1256_v37 = vld [vmem:[%s2060_s6 + $0xc] sm:$0x1] }
   0x7   :  { %1573 = vst [vmem:[#allocation7 + $0x18] sm:$0xff] %v1567_v5   ;;  %vm41_vm1 = vcmp.lt.s32.totalorder %v1698_v8, 2  ;;  %v1707_v13 = vadd.s32 128, %v65_v9  ;;  %v89_v22 = vunpack.c.l.bf16 %v1246_v20  ;;  %v1538_v29 = vld [vmem:[%s2054_s0 + $0x60] sm:$0xff]  ;;  %v1529_v36 = vld [vmem:[%s2054_s0 + $0x18] sm:$0xff]  ;;  %v359_v38 = vunpack.c.l.bf16 %v1256_v37  ;;  %v1536_v42 = vld [vmem:[%s2054_s0 + $0x50] sm:$0xff] }
   0x8   :  { %1578 = vst [vmem:[#allocation7 + $0x28] sm:$0xff] %v1567_v5   ;;  %v834_v14 = vsel %vm832_vm0, %v786_v10, 0  ;;  %837 = vmatpush.bf16.msra.mxu0 %v1532_v7  ;;  %1620 = vmatpush.bf16.msra.mxu3 %v1532_v7  ;;  %v63_v23 = vsel %vm41_vm1, %v57_v17, %v1685_v1  ;;  %v42_v24 = vsel %vm41_vm1, %v36_v18, %v1685_v1  ;;  %v1530_v30 = vld [vmem:[%s2054_s0 + $0x20] sm:$0xff]  ;;  %v1528_v43 = vld [vmem:[%s2054_s0 + $0x10] sm:$0xff]  ;;  %v1535_v52 = vld [vmem:[%s2054_s0 + $0x48] sm:$0xff] }
   0x9   :  { %1583 = vst [vmem:[#allocation7 + $0x38] sm:$0xff] %v1567_v5   ;;  %896 = vmatpush.bf16.msra.mxu1 %v834_v14  ;;  %vm67_vm2 = vcmp.lt.s32.totalorder %v1707_v13, 230  ;;  %1627 = vmatpush.bf16.msra.mxu2 %v834_v14  ;;  %v48_v26 = vpack.c.bf16 0.0, %v42_v24  ;;  %v117_v27 = vsel %vm41_vm1, %v111_v21, %v1685_v1  ;;  %v95_v28 = vsel %vm41_vm1, %v89_v22, %v1685_v1  ;;  %v1249_v39 = vld [vmem:[%s2060_s6 + $0x5] sm:$0x1]  ;;  %v1527_v53 = vld [vmem:[%s2054_s0 + $0x8] sm:$0xff] }
   0xa   :  { %1588 = vst [vmem:[#allocation7 + $0x48] sm:$0xff] %v1567_v5   ;;  %v68_v25 = vsel %vm67_vm2, %v63_v23, %v1685_v1  ;;  %v122_v32 = vsel %vm67_vm2, %v117_v27, %v1685_v1  ;;  %v102_v34 = vpack.c.bf16 0.0, %v95_v28  ;;  %v165_v40 = vunpack.c.l.bf16 %v1249_v39  ;;  %v1248_v41 = vld [vmem:[%s2060_s6 + $0x4] sm:$0x1]  ;;  %v1258_v2 = vld [vmem:[%s2060_s6 + $0xe] sm:$0x1] }
   0xb   :  { %1593 = vst [vmem:[#allocation7 + $0x58] sm:$0xff] %v1567_v5   ;;  %v70_v31 = vpack.c.bf16 0.0, %v68_v25  ;;  %v124_v33 = vpack.c.bf16 0.0, %v122_v32  ;;  %v365_v44 = vsel %vm41_vm1, %v359_v38, %v1685_v1  ;;  %v143_v45 = vunpack.c.l.bf16 %v1248_v41  ;;  %v1534_v54 = vld [vmem:[%s2054_s0 + $0x40] sm:$0xff]  ;;  %v1260_v32 = vld [vmem:[%s2060_s6 + $0x10] sm:$0x1] }
   0xc   :  { %1598 = vst [vmem:[#allocation7 + $0x68] sm:$0xff] %v1567_v5   ;;  %838 = vmatpush.bf16.msra.mxu0 %v1531_v12  ;;  %1621 = vmatpush.bf16.msra.mxu3 %v1531_v12  ;;  %v372_v46 = vpack.c.bf16 0.0, %v365_v44  ;;  %v171_v47 = vsel %vm41_vm1, %v165_v40, %v1685_v1  ;;  %v1526_v55 = vld [vmem:[%s2054_s0] sm:$0xff]  ;;  %v413_v3 = vunpack.c.l.bf16 %v1258_v2  ;;  %v1252_v39 = vld [vmem:[%s2060_s6 + $0x8] sm:$0x1] }
   0xd   :  { %1603 = vst [vmem:[#allocation7 + $0x78] sm:$0xff] %v1567_v5   ;;  %897 = vmatpush.bf16.msra.mxu1 %v1539_v11  ;;  %1628 = vmatpush.bf16.msra.mxu2 %v1539_v11  ;;  %v176_v48 = vsel %vm67_vm2, %v171_v47, %v1685_v1  ;;  %v149_v49 = vsel %vm41_vm1, %v143_v45, %v1685_v1  ;;  %v1268_v56 = vld [vmem:[#allocation7 + $0x8] sm:$0xf0]  ;;  %v1507_v59 = vld [vmem:[#allocation7 + $0x4] sm:$0xf0] }
   0xe   :  { %1608 = vst [vmem:[#allocation7 + $0x88] sm:$0xff] %v1567_v5   ;;  %v178_v50 = vpack.c.bf16 0.0, %v176_v48  ;;  %v156_v51 = vpack.c.bf16 0.0, %v149_v49  ;;  %v1251_v4 = vld [vmem:[%s2060_s6 + $0x7] sm:$0x1]  ;;  %v419_v10 = vsel %vm41_vm1, %v413_v3, %v1685_v1 }
   0xf   :  { %1613 = vst [vmem:[#allocation7 + $0x98] sm:$0xff] %v1567_v5   ;;  %v1259_v5 = vld [vmem:[%s2060_s6 + $0xf] sm:$0x1]  ;;  %v219_v6 = vunpack.c.l.bf16 %v1251_v4  ;;  %v1250_v7 = vld [vmem:[%s2060_s6 + $0x6] sm:$0x1]  ;;  %v426_v12 = vpack.c.bf16 0.0, %v419_v10 }
  0x10   :  { %73 = vst [vmem:[#allocation7 + $0x4] sm:$0xf] %v70_v31  ;;  %839 = vmatpush.bf16.msra.mxu0 %v1530_v30  ;;  %1622 = vmatpush.bf16.msra.mxu3 %v1530_v30  ;;  %v435_v9 = vunpack.c.l.bf16 %v1259_v5  ;;  %v197_v11 = vunpack.c.l.bf16 %v1250_v7  ;;  %v1276_v22 = vld [vmem:[#allocation7 + $0x18] sm:$0xf0]  ;;  %v1509_v25 = vld [vmem:[#allocation7 + $0x14] sm:$0xf0] }
  0x11   :  { %51 = vst [vmem:[#allocation7] sm:$0xf] %v48_v26  ;;  %898 = vmatpush.bf16.msra.mxu1 %v1538_v29  ;;  %1629 = vmatpush.bf16.msra.mxu2 %v1538_v29  ;;  %v225_v14 = vsel %vm41_vm1, %v219_v6, %v1685_v1  ;;  %v1255_v2 = vld [vmem:[%s2060_s6 + $0xb] sm:$0x1]  ;;  %v1263_v3 = vld [vmem:[%s2060_s6 + $0x13] sm:$0x1] }
  0x12   :  { %127 = vst [vmem:[#allocation7 + $0x14] sm:$0xf] %v124_v33  ;;  %v441_v15 = vsel %vm41_vm1, %v435_v9, %v1685_v1  ;;  %v230_v16 = vsel %vm67_vm2, %v225_v14, %v1685_v1  ;;  %v203_v17 = vsel %vm41_vm1, %v197_v11, %v1685_v1  ;;  %v327_v5 = vunpack.c.l.bf16 %v1255_v2  ;;  %v1254_v6 = vld [vmem:[%s2060_s6 + $0xa] sm:$0x1]  ;;  %v1517_v8 = vld [vmem:[#allocation7 + $0x54] sm:$0xf0] }
  0x13   :  { %105 = vst [vmem:[#allocation7 + $0x10] sm:$0xf] %v102_v34  ;;  %v1519_v60 = vld [vmem:[#allocation7 + $0x64] sm:$0xf0]  ;;  %v446_v18 = vsel %vm67_vm2, %v441_v15, %v1685_v1  ;;  %v232_v19 = vpack.c.bf16 0.0, %v230_v16  ;;  %v210_v20 = vpack.c.bf16 0.0, %v203_v17  ;;  %v467_v34 = vunpack.c.l.bf16 %v1260_v32 }
  0x14   :  { %840 = vmatpush.bf16.msra.mxu0 %v1529_v36  ;;  %1623 = vmatpush.bf16.msra.mxu3 %v1529_v36  ;;  %375 = vst [vmem:[#allocation7 + $0x60] sm:$0xf] %v372_v46  ;;  %v448_v21 = vpack.c.bf16 0.0, %v446_v18  ;;  %v1521_v26 = vld [vmem:[#allocation7 + $0x74] sm:$0xf0]  ;;  %v543_v7 = vunpack.c.l.bf16 %v1263_v3  ;;  %v305_v10 = vunpack.c.l.bf16 %v1254_v6 }
  0x15   :  { %899 = vmatpush.bf16.msra.mxu1 %v1537_v35  ;;  %1630 = vmatpush.bf16.msra.mxu2 %v1537_v35  ;;  %181 = vst [vmem:[#allocation7 + $0x24] sm:$0xf] %v178_v50  ;;  %v1324_v31 = vld [vmem:[#allocation7 + $0x78] sm:$0xf0]  ;;  %v1253_v35 = vld [vmem:[%s2060_s6 + $0x9] sm:$0x1]  ;;  %v473_v41 = vsel %vm41_vm1, %v467_v34, %v1685_v1 }
  0x16   :  { %159 = vst [vmem:[#allocation7 + $0x20] sm:$0xf] %v156_v51  ;;  %v1261_v36 = vld [vmem:[%s2060_s6 + $0x11] sm:$0x1]  ;;  %v273_v38 = vunpack.c.l.bf16 %v1253_v35  ;;  %v549_v14 = vsel %vm41_vm1, %v543_v7, %v1685_v1  ;;  %v311_v16 = vsel %vm41_vm1, %v305_v10, %v1685_v1  ;;  %v1257_v32 = vld [vmem:[%s2060_s6 + $0xd] sm:$0x1] }
  0x17   :  { %v1506_v57 = vld [vmem:[#allocation7 + $0x4] sm:$0xf]  ;;  %429 = vst [vmem:[#allocation7 + $0x70] sm:$0xf] %v426_v12  ;;  %v489_v40 = vunpack.c.l.bf16 %v1261_v36  ;;  %v333_v12 = vsel %vm41_vm1, %v327_v5, %v1685_v1  ;;  %v554_v17 = vsel %vm67_vm2, %v549_v14, %v1685_v1  ;;  %v381_v34 = vunpack.c.l.bf16 %v1257_v32  ;;  %v1316_v13 = vld [vmem:[#allocation7 + $0x68] sm:$0xf0] }
  0x18   :  { %841 = vmatpush.bf16.msra.mxu0 %v1528_v43  ;;  %1624 = vmatpush.bf16.msra.mxu3 %v1528_v43  ;;  %v1266_v58 = vld [vmem:[#allocation7] sm:$0xf]  ;;  %v1271_v62 = vor.u32 %v1506_v57, %v1268_v56  ;;  %235 = vst [vmem:[#allocation7 + $0x34] sm:$0xf] %v232_v19  ;;  %v480_v43 = vpack.c.bf16 0.0, %v473_v41  ;;  %v279_v44 = vsel %vm41_vm1, %v273_v38, %v1685_v1  ;;  %v318_v19 = vpack.c.bf16 0.0, %v311_v16 }
  0x19   :  { %900 = vmatpush.bf16.msra.mxu1 %v1536_v42  ;;  %1631 = vmatpush.bf16.msra.mxu2 %v1536_v42  ;;  %v1267_v63 = vor.u32 %v1507_v59, %v1266_v58  ;;  %213 = vst [vmem:[#allocation7 + $0x30] sm:$0xf] %v210_v20  ;;  %v1508_v23 = vld [vmem:[#allocation7 + $0x14] sm:$0xf]  ;;  %v251_v42 = vunpack.c.l.bf16 %v1252_v39  ;;  %v495_v45 = vsel %vm41_vm1, %v489_v40, %v1685_v1  ;;  %v1523_v56 = vld [vmem:[#allocation7 + $0x84] sm:$0xf0] }
  0x1a   :  { %451 = vst [vmem:[#allocation7 + $0x74] sm:$0xf] %v448_v21  ;;  %v1274_v24 = vld [vmem:[#allocation7 + $0x10] sm:$0xf]  ;;  %v1279_v28 = vor.u32 %v1508_v23, %v1276_v22  ;;  %v284_v46 = vsel %vm67_vm2, %v279_v44, %v1685_v1  ;;  %v500_v48 = vsel %vm67_vm2, %v495_v45, %v1685_v1  ;;  %v338_v15 = vsel %vm67_vm2, %v333_v12, %v1685_v1  ;;  %v1292_v21 = vld [vmem:[#allocation7 + $0x38] sm:$0xf0] }
  0x1b   :  { %v1314_v61 = vld [vmem:[#allocation7 + $0x60] sm:$0xf]  ;;  %v1275_v29 = vor.u32 %v1509_v25, %v1274_v24  ;;  %v257_v47 = vsel %vm41_vm1, %v251_v42, %v1685_v1  ;;  %483 = vst [vmem:[#allocation7 + $0x80] sm:$0xf] %v480_v43  ;;  %v286_v49 = vpack.c.bf16 0.0, %v284_v46  ;;  %v502_v51 = vpack.c.bf16 0.0, %v500_v48 }
  0x1c   :  { %842 = vmatpush.bf16.msra.mxu0 %v1527_v53  ;;  %1625 = vmatpush.bf16.msra.mxu3 %v1527_v53  ;;  %v1315_v0 = vor.u32 %v1519_v60, %v1314_v61  ;;  %v264_v50 = vpack.c.bf16 0.0, %v257_v47  ;;  %v1510_v53 = vld [vmem:[#allocation7 + $0x24] sm:$0xf]  ;;  %v1332_v61 = vld [vmem:[#allocation7 + $0x88] sm:$0xf0]  ;;  %v340_v18 = vpack.c.bf16 0.0, %v338_v15  ;;  %v387_v35 = vsel %vm41_vm1, %v381_v34, %v1685_v1 }
  0x1d   :  { %901 = vmatpush.bf16.msra.mxu1 %v1535_v52  ;;  %1632 = vmatpush.bf16.msra.mxu2 %v1535_v52  ;;  %289 = vst [vmem:[#allocation7 + $0x44] sm:$0xf] %v286_v49  ;;  %v1284_v52 = vld [vmem:[#allocation7 + $0x28] sm:$0xf0]  ;;  %v556_v20 = vpack.c.bf16 0.0, %v554_v17  ;;  %v392_v36 = vsel %vm67_vm2, %v387_v35, %v1685_v1  ;;  %v1555_v2 = vld [vmem:[%s2056_s2 + $0x78] sm:$0xff] }
  0x1e   :  { %v1322_v27 = vld [vmem:[#allocation7 + $0x70] sm:$0xf]  ;;  %267 = vst [vmem:[#allocation7 + $0x40] sm:$0xf] %v264_v50  ;;  %v1287_v58 = vor.u32 %v1510_v53, %v1284_v52  ;;  %v1513_v24 = vld [vmem:[#allocation7 + $0x34] sm:$0xf0] }
  0x1f   :  { %v1323_v30 = vor.u32 %v1521_v26, %v1322_v27  ;;  %505 = vst [vmem:[#allocation7 + $0x84] sm:$0xf] %v502_v51  ;;  %v1512_v22 = vld [vmem:[#allocation7 + $0x34] sm:$0xf]  ;;  %v1525_v25 = vld [vmem:[#allocation7 + $0x94] sm:$0xf0] }
  0x20   :  { %843 = vmatpush.bf16.msra.mxu0 %v1526_v55  ;;  %1626 = vmatpush.bf16.msra.mxu3 %v1526_v55  ;;  %v1511_v55 = vld [vmem:[#allocation7 + $0x24] sm:$0xf0]  ;;  %343 = vst [vmem:[#allocation7 + $0x54] sm:$0xf] %v340_v18  ;;  %v1290_v23 = vld [vmem:[#allocation7 + $0x30] sm:$0xf]  ;;  %v1295_v27 = vor.u32 %v1512_v22, %v1292_v21 }
  0x21   :  { %902 = vmatpush.bf16.msra.mxu1 %v1534_v54  ;;  %1633 = vmatpush.bf16.msra.mxu2 %v1534_v54  ;;  %v1520_v33 = vld [vmem:[#allocation7 + $0x74] sm:$0xf]  ;;  %v1282_v54 = vld [vmem:[#allocation7 + $0x20] sm:$0xf]  ;;  %321 = vst [vmem:[#allocation7 + $0x50] sm:$0xf] %v318_v19 }
  0x22   :  { %v1327_v37 = vor.u32 %v1520_v33, %v1324_v31  ;;  %v1330_v57 = vld [vmem:[#allocation7 + $0x80] sm:$0xf]  ;;  %v1283_v59 = vor.u32 %v1511_v55, %v1282_v54  ;;  %559 = vst [vmem:[#allocation7 + $0x94] sm:$0xf] %v556_v20  ;;  %v1300_v38 = vld [vmem:[#allocation7 + $0x48] sm:$0xf0] }
  0x23   :  { %844 = vmatmul.bf16.vlgmr.msra.gmra.mxu0 %v1267_v63  ;;  %874 = vmatmul.bf16.vlgmr.msra.gmra.mxu3 %v1315_v0  ;;  %v1331_v60 = vor.u32 %v1523_v56, %v1330_v57  ;;  %v1515_v41 = vld [vmem:[#allocation7 + $0x44] sm:$0xf0]  ;;  %v1308_v44 = vld [vmem:[#allocation7 + $0x58] sm:$0xf0]  ;;  %v1903_v50 = vld [vmem:[%s2055_s1] ss:$0 sm:$0xff] }
  0x24   :  { %1400 = vmatmul.msk.bf16.vlgmr.msra.gmra.mxu1 %vm801_vm3, %v1271_v62  ;;  %1407 = vmatmul.msk.bf16.vlgmr.msra.gmra.mxu2 %vm801_vm3, %v1327_v37  ;;  %v1262_v62 = vld [vmem:[%s2060_s6 + $0x12] sm:$0x1]  ;;  %v394_v37 = vpack.c.bf16 0.0, %v392_v36  ;;  %v1514_v39 = vld [vmem:[#allocation7 + $0x44] sm:$0xf]  ;;  %v1547_v16 = vld [vmem:[%s2056_s2 + $0x38] sm:$0xff] }
  0x25   :  { %v521_v0 = vunpack.c.l.bf16 %v1262_v62  ;;  %v1298_v40 = vld [vmem:[#allocation7 + $0x40] sm:$0xf]  ;;  %v1303_v42 = vor.u32 %v1514_v39, %v1300_v38  ;;  %1138 = vmatpush.bf16.msrb.mxu3 %v1555_v2  ;;  %v1554_v5 = vld [vmem:[%s2056_s2 + $0x70] sm:$0xff]  ;;  %v1553_v17 = vld [vmem:[%s2056_s2 + $0x68] sm:$0xff]  ;;  %1124 = vmatpush.bf16.msrb.mxu2 %v1547_v16 }
  0x26   :  { %v1522_v63 = vld [vmem:[#allocation7 + $0x84] sm:$0xf]  ;;  %397 = vst [vmem:[#allocation7 + $0x64] sm:$0xf] %v394_v37  ;;  %v1299_v43 = vor.u32 %v1515_v41, %v1298_v40  ;;  %v1546_v22 = vld [vmem:[%s2056_s2 + $0x30] sm:$0xff]  ;;  %v1549_v35 = vld [vmem:[%s2056_s2 + $0x48] sm:$0xff] }
  0x27   :  { %v1335_v4 = vor.u32 %v1522_v63, %v1332_v61  ;;  %v527_v9 = vsel %vm41_vm1, %v521_v0, %v1685_v1  ;;  %v1516_v45 = vld [vmem:[#allocation7 + $0x54] sm:$0xf]  ;;  %v1543_v37 = vld [vmem:[%s2056_s2 + $0x18] sm:$0xff]  ;;  %v1548_v40 = vld [vmem:[%s2056_s2 + $0x40] sm:$0xff] }
  0x28   :  { %v534_v11 = vpack.c.bf16 0.0, %v527_v9  ;;  %v1306_v46 = vld [vmem:[#allocation7 + $0x50] sm:$0xf]  ;;  %v1311_v47 = vor.u32 %v1516_v45, %v1308_v44  ;;  %v1541_v45 = vld [vmem:[%s2056_s2 + $0x8] sm:$0xff] }
  0x29   :  { %v1524_v31 = vld [vmem:[#allocation7 + $0x94] sm:$0xf]  ;;  %v1307_v48 = vor.u32 %v1517_v8, %v1306_v46  ;;  %1139 = vmatpush.bf16.msrb.mxu3 %v1554_v5  ;;  %1125 = vmatpush.bf16.msrb.mxu2 %v1546_v22 }
  0x2a   :  { %537 = vst [vmem:[#allocation7 + $0x90] sm:$0xf] %v534_v11  ;;  %v1550_v34 = vld [vmem:[%s2056_s2 + $0x50] sm:$0xff] }
  0x2d   :  { %v1518_v1 = vld [vmem:[#allocation7 + $0x64] sm:$0xf]  ;;  %1140 = vmatpush.bf16.msrb.mxu3 %v1553_v17 }
  0x2e   :  { %v1319_v49 = vor.u32 %v1518_v1, %v1316_v13 }
  0x31   :  { %v1338_v26 = vld [vmem:[#allocation7 + $0x90] sm:$0xf] }
  0x33   :  { %849 = vmatmul.bf16.gmra.mxu0 %v1275_v29  ;;  %879 = vmatmul.bf16.gmra.mxu3 %v1323_v30  ;;  %v1339_v29 = vor.u32 %v1525_v25, %v1338_v26  ;;  %v1340_v30 = vld [vmem:[#allocation7 + $0x98] sm:$0xf0]  ;;  %v1545_v25 = vld [vmem:[%s2056_s2 + $0x28] sm:$0xff] }
  0x34   :  { %1401 = vmatmul.msk.bf16.gmra.mxu1 %vm801_vm3, %v1279_v28  ;;  %1408 = vmatmul.msk.bf16.gmra.mxu2 %vm801_vm3, %v1335_v4  ;;  %v1291_v28 = vor.u32 %v1513_v24, %v1290_v23  ;;  %v1343_v33 = vor.u32 %v1524_v31, %v1340_v30  ;;  %v1552_v23 = vld [vmem:[%s2056_s2 + $0x60] sm:$0xff] }
  0x35   :  { %1141 = vmatpush.bf16.msrb.mxu3 %v1552_v23  ;;  %1126 = vmatpush.bf16.msrb.mxu2 %v1545_v25  ;;  %v1544_v30 = vld [vmem:[%s2056_s2 + $0x20] sm:$0xff] }
  0x39   :  { %1127 = vmatpush.bf16.msrb.mxu2 %v1544_v30 }
  0x3d   :  { %1128 = vmatpush.bf16.msrb.mxu2 %v1543_v37 }
  0x43   :  { %854 = vmatmul.bf16.gmra.mxu0 %v1283_v59  ;;  %884 = vmatmul.bf16.gmra.mxu3 %v1331_v60 }
  0x44   :  { %1402 = vmatmul.msk.bf16.gmra.mxu1 %vm801_vm3, %v1287_v58  ;;  %1409 = vmatmul.msk.bf16.gmra.mxu2 %vm801_vm3, %v1343_v33 }
  0x53   :  { %859 = vmatmul.bf16.gmra.mxu0 %v1291_v28  ;;  %889 = vmatmul.bf16.gmra.mxu3 %v1339_v29  ;;  %v1551_v29 = vld [vmem:[%s2056_s2 + $0x58] sm:$0xff] }
  0x54   :  { %1403 = vmatmul.msk.bf16.gmra.mxu1 %vm801_vm3, %v1295_v27  ;;  %1142 = vmatpush.bf16.msrb.mxu3 %v1551_v29 }
  0x58   :  { %1143 = vmatpush.bf16.msrb.mxu3 %v1550_v34 }
  0x5c   :  { %1144 = vmatpush.bf16.msrb.mxu3 %v1549_v35 }
  0x60   :  { %1145 = vmatpush.bf16.msrb.mxu3 %v1548_v40 }
  0x63   :  { %864 = vmatmul.bf16.gmra.mxu0 %v1299_v43 }
  0x64   :  { %1404 = vmatmul.msk.bf16.gmra.mxu1 %vm801_vm3, %v1303_v42  ;;  %v1542_v42 = vld [vmem:[%s2056_s2 + $0x10] sm:$0xff] }
  0x65   :  { %1129 = vmatpush.bf16.msrb.mxu2 %v1542_v42 }
  0x69   :  { %1130 = vmatpush.bf16.msrb.mxu2 %v1541_v45 }
  0x73   :  { %869 = vmatmul.bf16.gmra.mxu0 %v1307_v48  ;;  %v1540_v48 = vld [vmem:[%s2056_s2] sm:$0xff] }
  0x74   :  { %1405 = vmatmul.msk.bf16.gmra.mxu1 %vm801_vm3, %v1311_v47  ;;  %1131 = vmatpush.bf16.msrb.mxu2 %v1540_v48 }
  0x84   :  { %1406 = vmatmul.msk.bf16.gmra.mxu1 %vm801_vm3, %v1319_v49 }
  0xa0   :  { %v845_v52 = vpop.f32.mrf.mxu0 }
  0xa1   :  { %v904_v51 = vpop.f32.mrf.mxu1  ;;  %v846_v53 = vadd.f32 %v1903_v50, %v845_v52 }
  0xa3   :  { %v905_v54 = vadd.f32 %v904_v51, %v846_v53 }
  0xa5   :  { %v954_v12 = vmax.f32 %v905_v54, 0.0 }
  0xa6   :  { %v1909_v59 = vpop.f32.mrf.mxu3 }
  0xa7   :  { %v1929_v15 = vpop.f32.mrf.mxu2 }
  0xa8   :  { %v847_v56 = vpop.f32.mrf.mxu0 }
  0xa9   :  { %v906_v55 = vpop.f32.mrf.mxu1  ;;  %v848_v57 = vadd.f32 %v1903_v50, %v847_v56 }
  0xab   :  { %v1907_v58 = vadd.f32 %v906_v55, %v848_v57  ;;  %v1563_v55 = vld [vmem:[%s2058_s4 + $0x38] sm:$0xff] }
  0xac   :  { %1223 = vmatpush.bf16.msra.mxu2 %v1563_v55 }
  0xae   :  { %v1914_v0 = vpop.f32.mrf.mxu3 }
  0xaf   :  { %v1949_v24 = vpop.f32.mrf.mxu2 }
  0xb0   :  { %v850_v61 = vpop.f32.mrf.mxu0 }
  0xb1   :  { %v909_v60 = vpop.f32.mrf.mxu1  ;;  %v851_v62 = vadd.f32 %v1903_v50, %v850_v61 }
  0xb3   :  { %v1912_v63 = vadd.f32 %v909_v60, %v851_v62 }
  0xb6   :  { %v1927_v10 = vpop.f32.mrf.mxu3 }
  0xb7   :  { %v1962_v33 = vpop.f32.mrf.mxu2  ;;  %v881_v60 = vadd.f32 %v1903_v50, %v1927_v10 }
  0xb8   :  { %v1921_v4 = vpop.f32.mrf.mxu0 }
  0xb9   :  { %v1919_v3 = vpop.f32.mrf.mxu1  ;;  %v853_v53 = vadd.f32 %v1903_v50, %v1921_v4  ;;  %v956_v4 = vmax.f32 %v1912_v63, 0.0  ;;  %v940_v10 = vadd.f32 %v1929_v15, %v881_v60  ;;  %v876_v15 = vadd.f32 %v1903_v50, %v1909_v59 }
  0xbb   :  { %v968_v30 = vmax.f32 %v940_v10, 0.0 }
  0xbe   :  { %v882_v21 = vpop.f32.mrf.mxu3 }
  0xbf   :  { %v1978_v41 = vpop.f32.mrf.mxu2  ;;  %v883_v62 = vadd.f32 %v1903_v50, %v882_v21 }
  0xc0   :  { %v855_v7 = vpop.f32.mrf.mxu0 }
  0xc1   :  { %v914_v6 = vpop.f32.mrf.mxu1  ;;  %v856_v9 = vadd.f32 %v1903_v50, %v855_v7  ;;  %v942_v22 = vadd.f32 %v1949_v24, %v883_v62 }
  0xc3   :  { %v915_v11 = vadd.f32 %v914_v6, %v856_v9  ;;  %v912_v6 = vadd.f32 %v1919_v3, %v853_v53  ;;  %v969_v34 = vmax.f32 %v942_v22, 0.0  ;;  %v955_v53 = vmax.f32 %v1907_v58, 0.0 }
  0xc5   :  { %v958_v14 = vmax.f32 %v915_v11, 0.0 }
  0xc6   :  { %v1954_v28 = vpop.f32.mrf.mxu3 }
  0xc7   :  { %v1937_v18 = vmax.f32 %v954_v12, %v958_v14  ;;  %v949_v47 = vpop.f32.mrf.mxu2  ;;  %v886_v59 = vadd.f32 %v1903_v50, %v1954_v28 }
  0xc8   :  { %v1941_v20 = vpop.f32.mrf.mxu0 }
  0xc9   :  { %v1939_v19 = vpop.f32.mrf.mxu1  ;;  %v858_v29 = vadd.f32 %v1903_v50, %v1941_v20  ;;  %v945_v55 = vadd.f32 %v1962_v33, %v886_v59  ;;  %v1560_v33 = vld [vmem:[%s2058_s4 + $0x20] sm:$0xff] }
  0xcb   :  { %v917_v45 = vadd.f32 %v1939_v19, %v858_v29  ;;  %v878_v19 = vadd.f32 %v1903_v50, %v1914_v0  ;;  %v1561_v0 = vld [vmem:[%s2058_s4 + $0x28] sm:$0xff] }
  0xce   :  { %v1970_v36 = vpop.f32.mrf.mxu3 }
  0xcf   :  { %v951_v11 = vpop.f32.mrf.mxu2 }
  0xd0   :  { %v860_v27 = vpop.f32.mrf.mxu0 }
  0xd1   :  { %v919_v26 = vpop.f32.mrf.mxu1  ;;  %v861_v8 = vadd.f32 %v1903_v50, %v860_v27 }
  0xd3   :  { %v920_v49 = vadd.f32 %v919_v26, %v861_v8  ;;  %v957_v26 = vmax.f32 %v912_v6, 0.0  ;;  %v1557_v6 = vld [vmem:[%s2058_s4 + $0x8] sm:$0xff] }
  0xd5   :  { %v960_v57 = vmax.f32 %v920_v49, 0.0  ;;  %v959_v49 = vmax.f32 %v917_v45, 0.0 }
  0xd6   :  { %v890_v46 = vpop.f32.mrf.mxu3 }
  0xd7   :  { %v891_v5 = vadd.f32 %v1903_v50, %v890_v46  ;;  %v976_v16 = vmax.f32 %v956_v4, %v960_v57  ;;  %v1558_v4 = vld [vmem:[%s2058_s4 + $0x10] sm:$0xff] }
  0xd8   :  { %v862_v32 = vpop.f32.mrf.mxu0 }
  0xd9   :  { %v921_v31 = vpop.f32.mrf.mxu1  ;;  %v863_v51 = vadd.f32 %v1903_v50, %v862_v32  ;;  %v950_v25 = vadd.f32 %v949_v47, %v891_v5 }
  0xdb   :  { %v922_v61 = vadd.f32 %v921_v31, %v863_v51  ;;  %v972_v37 = vmax.f32 %v950_v25, 0.0 }
  0xdd   :  { %v961_v17 = vmax.f32 %v922_v61, 0.0  ;;  %v970_v61 = vmax.f32 %v945_v55, 0.0 }
  0xde   :  { %v892_v56 = vpop.f32.mrf.mxu3 }
  0xdf   :  { %v893_v9 = vadd.f32 %v1903_v50, %v892_v56  ;;  %v977_v31 = vmax.f32 %v957_v26, %v961_v17 }
  0xe0   :  { %v865_v39 = vpop.f32.mrf.mxu0 }
  0xe1   :  { %v924_v38 = vpop.f32.mrf.mxu1  ;;  %v866_v2 = vadd.f32 %v1903_v50, %v865_v39  ;;  %v952_v3 = vadd.f32 %v951_v11, %v893_v9 }
  0xe3   :  { %v925_v23 = vadd.f32 %v924_v38, %v866_v2  ;;  %v973_v40 = vmax.f32 %v952_v3, 0.0 }
  0xe5   :  { %v962_v35 = vmax.f32 %v925_v23, 0.0 }
  0xe7   :  { %v978_v20 = vmax.f32 %v1937_v18, %v962_v35 }
  0xe8   :  { %v867_v44 = vpop.f32.mrf.mxu0 }
  0xe9   :  { %v926_v43 = vpop.f32.mrf.mxu1  ;;  %v868_v24 = vadd.f32 %v1903_v50, %v867_v44  ;;  %v888_v44 = vadd.f32 %v1903_v50, %v1970_v36 }
  0xeb   :  { %v927_v47 = vadd.f32 %v926_v43, %v868_v24  ;;  %v975_v43 = vmax.f32 %v955_v53, %v959_v49  ;;  %v947_v56 = vadd.f32 %v1978_v41, %v888_v44  ;;  %v1559_v41 = vld [vmem:[%s2058_s4 + $0x18] sm:$0xff] }
  0xed   :  { %v971_v36 = vmax.f32 %v947_v56, 0.0 }
  0xf0   :  { %v870_v13 = vpop.f32.mrf.mxu0 }
  0xf1   :  { %v929_v1 = vpop.f32.mrf.mxu1  ;;  %v871_v52 = vadd.f32 %v1903_v50, %v870_v13 }
  0xf3   :  { %v930_v54 = vadd.f32 %v929_v1, %v871_v52 }
  0xf5   :  { %v964_v7 = vmax.f32 %v930_v54, 0.0  ;;  %v963_v54 = vmax.f32 %v927_v47, 0.0 }
  0xf7   :  { %v980_v63 = vmax.f32 %v976_v16, %v964_v7  ;;  %v979_v60 = vmax.f32 %v975_v43, %v963_v54  ;;  %v1556_v7 = vld [vmem:[%s2058_s4] sm:$0xff] }
  0xf8   :  { %v872_v14 = vpop.f32.mrf.mxu0 }
  0xf9   :  { %v931_v12 = vpop.f32.mrf.mxu1  ;;  %v873_v21 = vadd.f32 %v1903_v50, %v872_v14  ;;  %v984_v38 = vmax.f32 %v980_v63, %v968_v30  ;;  %v1562_v50 = vld [vmem:[%s2058_s4 + $0x30] sm:$0xff] }
  0xfa   :  { %1224 = vmatpush.bf16.msra.mxu2 %v1562_v50 }
  0xfb   :  { %v932_v27 = vadd.f32 %v931_v12, %v873_v21  ;;  %v988_v48 = vmax.f32 %v984_v38, %v972_v37  ;;  %v1635_v12 = vld [vmem:[%s2057_s3] ss:$0 sm:$0xff] }
  0xfd   :  { %v965_v32 = vmax.f32 %v932_v27, 0.0  ;;  %v1636_v27 = vld [vmem:[%s2059_s5] ss:$0 sm:$0xff] }
  0xfe   :  { %1225 = vmatpush.bf16.msra.mxu2 %v1561_v0 }
  0xff   :  { %v981_v39 = vmax.f32 %v977_v31, %v965_v32 }
 0x101   :  { %v934_v42 = vpop.f32.mrf.mxu1  ;;  %v985_v46 = vmax.f32 %v981_v39, %v969_v34 }
 0x102   :  { %v935_v8 = vadd.f32 %v934_v42, %v876_v15  ;;  %1226 = vmatpush.bf16.msra.mxu2 %v1560_v33 }
 0x103   :  { %v989_v1 = vmax.f32 %v985_v46, %v973_v40 }
 0x104   :  { %v966_v13 = vmax.f32 %v935_v8, 0.0 }
 0x105   :  { %v991_v52 = vpack.c.bf16 %v989_v1, %v988_v48 }
 0x106   :  { %v982_v51 = vmax.f32 %v978_v20, %v966_v13  ;;  %1227 = vmatpush.bf16.msra.mxu2 %v1559_v41 }
 0x107   :  { %1146 = vmatmul.bf16.vlgmr.msrb.gmra.mxu3 %v991_v52 }
 0x108   :  { %v986_v2 = vmax.f32 %v982_v51, %v970_v61 }
 0x109   :  { %v936_v18 = vpop.f32.mrf.mxu1 }
 0x10a   :  { %v937_v28 = vadd.f32 %v936_v18, %v878_v19  ;;  %1228 = vmatpush.bf16.msra.mxu2 %v1558_v4 }
 0x10c   :  { %v967_v57 = vmax.f32 %v937_v28, 0.0 }
 0x10e   :  { %v983_v62 = vmax.f32 %v979_v60, %v967_v57  ;;  %1229 = vmatpush.bf16.msra.mxu2 %v1557_v6 }
 0x110   :  { %v987_v5 = vmax.f32 %v983_v62, %v971_v36 }
 0x112   :  { %v990_v58 = vpack.c.bf16 %v987_v5, %v986_v2  ;;  %1230 = vmatpush.bf16.msra.mxu2 %v1556_v7 }
 0x114   :  { %1132 = vmatmul.bf16.vlgmr.msrb.gmra.mxu2 %v990_v58 }
 0x18a   :  { %v1147_v9 = vpop.f32.mrf.mxu3 }
 0x192   :  { %v1149_v21 = vpop.f32.mrf.mxu3 }
 0x197   :  { %v1133_v11 = vpop.f32.mrf.mxu2 }
 0x198   :  { %v1134_v14 = vadd.f32 %v1635_v12, %v1133_v11 }
 0x19a   :  { %v1148_v10 = vadd.f32 %v1147_v9, %v1134_v14 }
 0x19c   :  { %v1152_v23 = vmax.f32 %v1148_v10, 0.0 }
 0x19f   :  { %v1135_v16 = vpop.f32.mrf.mxu2 }
 0x1a0   :  { %v1136_v17 = vadd.f32 %v1635_v12, %v1135_v16 }
 0x1a2   :  { %v1150_v22 = vadd.f32 %v1149_v21, %v1136_v17 }
 0x1a4   :  { %v1153_v25 = vmax.f32 %v1150_v22, 0.0 }
 0x1a6   :  { %v1154_v26 = vpack.c.bf16 %v1153_v25, %v1152_v23 }
 0x1a8   :  { %1231 = vmatmul.bf16.vlgmr.msra.gmra.mxu2 %v1154_v26 }
 0x22b   :  { %v1232_v63 = vpop.f32.mrf.mxu2 }
 0x22c   :  { %v1233_v29 = vadd.f32 %v1636_v27, %v1232_v63 }
 0x233   :  { %v1234_v3 = vpop.f32.mrf.mxu2 }
 0x234   :  { %v1235_v30 = vadd.f32 %v1636_v27, %v1234_v3 }
 0x236   :  { %v1617_v31 = vpack.c.bf16 %v1235_v30, %v1233_v29 }
 0x238   :  { %1618 = vst [vmem:[%s2062_s8] sm:$0xff] %v1617_v31  }

</bundles_post_ra>
